<compile_context>
chip_gen: v7x
topology: tpu7x:2x2x1
jax: 0.10.0
libtpu: 0.0.40
codegen_flags: <defaults>
</compile_context>

<pallas_src>
import functools
import math

import jax
import jax.numpy as jnp
from jax.experimental import pallas as pl
from jax.experimental.pallas import tpu as pltpu


# ------------------------- symbolic expression (static) ----------------------
# Parsed form of "0.5*x**2 + 1.5*x + 2 + 0.8*sin(x)" (same ordering the
# PyTorch _parse_expression produces: poly coeffs highest-degree first).
# TODO(synk): sympy parsing is host-side glue; the parsed term list is fixed
# in-script instead of being re-derived from the expression string.
POLY_TERMS = [(0.5, 2), (1.5, 1), (2.0, 0)]   # (coefficient, exponent)
SINE_TERMS = [(0.8,)]                          # (coefficient,)  function == sin


def _round_up(n, m):
    return ((n + m - 1) // m) * m


def _int_pow(z, e):
    """Static integer power (e >= 2) via repeated multiplies (stays on VPU)."""
    out = z
    for _ in range(e - 1):
        out = out * z
    return out


# ------------------------------- Pallas kernel -------------------------------
def tn_kernel(x_ref, wcat_ref, bias_ref, o_ref, *, terms, block_out):
    """One fused wide MXU matmul + per-term epilogue, all in VMEM.

    x_ref:    (TM, R*IN)           row tile (R original rows packed per row)
    wcat_ref: (R*IN, T*block_out)  concatenated block-diagonal weights;
                                   term t owns lanes [t*block_out, (t+1)*block_out)
    bias_ref: (1, block_out)       bias + folded constants, tiled R times
    o_ref:    (TM, block_out)
    terms:    static tuple of ("poly"|"sine", coeff, exponent); coeff == 1.0
              means the coefficient was already folded into the weight.
    """
    x = x_ref[...]
    w = wcat_ref[...]

    # Single wide MXU push instead of T skinny ones; accumulate in f32.
    z_all = jnp.dot(x, w, preferred_element_type=jnp.float32)

    acc = None
    for t, (kind, coeff, exponent) in enumerate(terms):
        z = z_all[:, t * block_out:(t + 1) * block_out]   # static 128-lane slice
        if kind == "poly":
            if exponent >= 2:
                z = _int_pow(z, exponent)
        else:  # "sine" -> EUP, separate bundle slot
            z = jnp.sin(z)
        if coeff != 1.0:
            z = z * coeff
        acc = z if acc is None else acc + z

    acc = acc + bias_ref[...]
    o_ref[...] = acc.astype(o_ref.dtype)


# --------------------------------- wrapper -----------------------------------
def tn_layer_forward(x, w_stacked, bias, poly_terms, sine_terms, *,
                     row_tile=512, gridless_max_rows=256,
                     compute_dtype=jnp.float32, out_dtype=jnp.float32):
    """TN_layer forward.

    x:         (B, IN) or (B, P, IN)
    w_stacked: (T, IN, OUT) — one pre-transposed weight per matmul term, in
               module order (poly terms with exponent>=1 first, then sines).
    bias:      (1, OUT)
    """
    orig_shape = x.shape
    x2 = x.reshape(-1, x.shape[-1]) if len(orig_shape) == 3 else x
    M, IN = x2.shape
    T_raw, IN2, OUT = w_stacked.shape
    assert IN == IN2

    # ---- host-side term fusion (would be cached per layer in real use) ----
    const_sum = 0.0
    lin_w = None
    term_list = []   # (kind, coeff, exponent) terms that survive to the kernel
    term_ws = []     # matching (IN, OUT) weights
    idx = 0
    for coeff, exponent in poly_terms:
        coeff, exponent = float(coeff), int(exponent)
        if exponent == 0:
            const_sum += coeff                       # fold constant into bias
            continue
        w = w_stacked[idx]
        idx += 1
        if exponent == 1:
            # merge every linear term into a single weight: sum_k c_k * W_k
            lin_w = coeff * w if lin_w is None else lin_w + coeff * w
        elif coeff > 0.0:
            # fold c^(1/e) into the weight: (x @ c^(1/e) W)^e == c (x @ W)^e
            term_ws.append((coeff ** (1.0 / exponent)) * w)
            term_list.append(("poly", 1.0, exponent))
        else:
            term_ws.append(w)
            term_list.append(("poly", coeff, exponent))
    if lin_w is not None:
        term_ws.append(lin_w)
        term_list.append(("poly", 1.0, 1))
    for (coeff,) in sine_terms:
        term_ws.append(w_stacked[idx])
        idx += 1
        term_list.append(("sine", float(coeff), 0))
    assert idx == T_raw
    T = len(term_ws)

    bias_eff = (bias.reshape(1, OUT) + const_sum).astype(jnp.float32)

    if T == 0:  # expression reduced to a constant — no matmul needed
        out2 = jnp.broadcast_to(bias_eff, (M, OUT)).astype(out_dtype)
        if len(orig_shape) == 3:
            out2 = out2.reshape(orig_shape[0], orig_shape[1], OUT)
        return out2

    # ---- lane-density fold: pack R rows per folded row so per-term output
    # width is exactly 128 lanes (full vregs, unmasked vst, dense HBM stream).
    if OUT < 128 and 128 % OUT == 0:
        R = math.gcd(M, 128 // OUT)
    else:
        R = 1
    Mr = M // R
    RIN, BOUT = R * IN, R * OUT

    if R > 1:
        eye = jnp.eye(R, dtype=jnp.float32)
        term_ws = [jnp.kron(eye, w) for w in term_ws]   # block-diag (R*IN, R*OUT)
    w_cat = jnp.concatenate(term_ws, axis=1)            # (R*IN, T*R*OUT)
    bias_f = jnp.tile(bias_eff, (1, R))                 # (1, R*OUT)

    xf = x2.reshape(Mr, RIN).astype(compute_dtype)
    w_cat = w_cat.astype(compute_dtype)

    kernel = functools.partial(tn_kernel, terms=tuple(term_list), block_out=BOUT)

    if Mr <= gridless_max_rows:
        # Tiny problem: gridless call, whole arrays resident in VMEM, no
        # pipeline bookkeeping and no double buffering.
        out_f = pl.pallas_call(
            kernel,
            out_shape=jax.ShapeDtypeStruct((Mr, BOUT), out_dtype),
            in_specs=[pl.BlockSpec(memory_space=pltpu.MemorySpace.VMEM)
                      for _ in range(3)],
            out_specs=pl.BlockSpec(memory_space=pltpu.MemorySpace.VMEM),
        )(xf, w_cat, bias_f)
    else:
        # Real batch: tile rows with a 1-D "parallel" grid. Cap the tile so
        # there are >= 2 grid steps (v7x has 2 TensorCores to shard across);
        # ragged last block instead of host-side pad + slice (reads padded,
        # out-of-range output rows masked on writeback).
        tile = _round_up(min(row_tile, pl.cdiv(Mr, 2)), 8)
        grid = (pl.cdiv(Mr, tile),)
        out_f = pl.pallas_call(
            kernel,
            out_shape=jax.ShapeDtypeStruct((Mr, BOUT), out_dtype),
            grid=grid,
            in_specs=[
                pl.BlockSpec((tile, RIN), lambda i: (i, 0)),
                pl.BlockSpec((RIN, T * BOUT), lambda i: (0, 0)),   # resident
                pl.BlockSpec((1, BOUT), lambda i: (0, 0)),         # resident
            ],
            out_specs=pl.BlockSpec((tile, BOUT), lambda i: (i, 0)),
            compiler_params=pltpu.CompilerParams(
                dimension_semantics=("parallel",)),
        )(xf, w_cat, bias_f)
        # NOTE: for scaled-up IN/OUT/T re-derive the tile for v7x's 64 MiB
        # physical / 32 MiB default-scoped VMEM and set vmem_limit_bytes.

    out2 = out_f.reshape(M, OUT)
    if len(orig_shape) == 3:
        out2 = out2.reshape(orig_shape[0], orig_shape[1], OUT)
    return out2


# ----------------------------- reference (pure JAX) ---------------------------
def tn_layer_ref(x, w_stacked, bias, poly_terms, sine_terms):
    orig_shape = x.shape
    if x.ndim == 3:
        x = x.reshape(-1, x.shape[-1])
    M = x.shape[0]
    OUT = w_stacked.shape[-1]

    def mm(a, b):
        return jnp.dot(a, b, precision=jax.lax.Precision.HIGHEST,
                       preferred_element_type=jnp.float32)

    result = jnp.zeros((M, OUT), jnp.float32)
    idx = 0
    for coeff, exponent in poly_terms:
        if exponent == 0:
            term = jnp.ones((M, OUT), jnp.float32)
        else:
            term = mm(x, w_stacked[idx])
            if exponent > 1:
                term = term ** exponent
            idx += 1
        result = result + coeff * term
    for (coeff,) in sine_terms:
        term = jnp.sin(mm(x, w_stacked[idx]))
        idx += 1
        result = result + coeff * term
    result = result + bias
    if len(orig_shape) == 3:
        result = result.reshape(orig_shape[0], orig_shape[1], OUT)
    return result


# ---------------------------------- main --------------------------------------
if __name__ == "__main__":
    IN_FEATURES, OUT_FEATURES = 32, 32

    key = jax.random.PRNGKey(0)
    kw, kb, kx2, kx3, kxl = jax.random.split(key, 5)

    # Deterministic parameter init mimicking the PyTorch module:
    # kaiming_uniform_(a=sqrt(5)) on an (out, in) weight == U(-1/sqrt(in), 1/sqrt(in));
    # bias == U(-1/sqrt(in), 1/sqrt(in)). Stored pre-transposed: (T, IN, OUT)
    # so term t computes x @ W[t].
    n_matmul_terms = sum(1 for (_, e) in POLY_TERMS if e >= 1) + len(SINE_TERMS)
    bound = 1.0 / math.sqrt(IN_FEATURES)
    w_stacked = jax.random.uniform(
        kw, (n_matmul_terms, IN_FEATURES, OUT_FEATURES),
        minval=-bound, maxval=bound, dtype=jnp.float32)
    bias = jax.random.uniform(
        kb, (1, OUT_FEATURES), minval=-bound, maxval=bound, dtype=jnp.float32)

    # Tolerance note: the kernel uses default MXU precision while the reference
    # uses Precision.HIGHEST; at IN=32 the gap is well under 2e-3.  The bf16
    # path squares a quantized matmul result, hence the looser 5e-2 bound.
    TOL_F32 = 2e-3
    TOL_BF16 = 5e-2

    # --- test 1: small 2-D batch (gridless, lane-dense fold R=4) ---
    x2d = jax.random.normal(kx2, (8, IN_FEATURES), dtype=jnp.float32)
    out2d = jax.block_until_ready(
        tn_layer_forward(x2d, w_stacked, bias, POLY_TERMS, SINE_TERMS))
    ref2d = tn_layer_ref(x2d, w_stacked, bias, POLY_TERMS, SINE_TERMS)
    assert out2d.shape == (8, OUT_FEATURES)
    assert jnp.allclose(out2d, ref2d, atol=TOL_F32, rtol=TOL_F32), "2-D mismatch"

    # --- test 2: 3-D (batch, num_patches, features) branch ---
    x3d = jax.random.normal(kx3, (2, 8, IN_FEATURES), dtype=jnp.float32)
    out3d = jax.block_until_ready(
        tn_layer_forward(x3d, w_stacked, bias, POLY_TERMS, SINE_TERMS))
    ref3d = tn_layer_ref(x3d, w_stacked, bias, POLY_TERMS, SINE_TERMS)
    assert out3d.shape == (2, 8, OUT_FEATURES)
    assert jnp.allclose(out3d, ref3d, atol=TOL_F32, rtol=TOL_F32), "3-D mismatch"

    # --- test 3: larger batch -> tiled "parallel" grid with a ragged last
    # block (2500 rows -> 625 folded rows -> 2 grid steps of 320, last masked) ---
    xlg = jax.random.normal(kxl, (2500, IN_FEATURES), dtype=jnp.float32)
    outlg = jax.block_until_ready(
        tn_layer_forward(xlg, w_stacked, bias, POLY_TERMS, SINE_TERMS))
    reflg = tn_layer_ref(xlg, w_stacked, bias, POLY_TERMS, SINE_TERMS)
    assert outlg.shape == (2500, OUT_FEATURES)
    assert jnp.allclose(outlg, reflg, atol=TOL_F32, rtol=TOL_F32), "tiled mismatch"

    # --- test 4: bf16 operands + bf16 output (HBM-byte reduction path) ---
    outbf = jax.block_until_ready(
        tn_layer_forward(xlg, w_stacked, bias, POLY_TERMS, SINE_TERMS,
                         compute_dtype=jnp.bfloat16, out_dtype=jnp.bfloat16))
    assert outbf.shape == (2500, OUT_FEATURES)
    assert jnp.allclose(outbf.astype(jnp.float32), reflg,
                        atol=TOL_BF16, rtol=TOL_BF16), "bf16 mismatch"

    print("KERNEL_OK")
</pallas_src>

<mosaic_0001>
module attributes {stable_mosaic.version = 11 : i64} {
  func.func @tn_kernel(%arg0: memref<2x128xf32, #tpu.memory_space<vmem>>, %arg1: memref<128x384xf32, #tpu.memory_space<vmem>>, %arg2: memref<1x128xf32, #tpu.memory_space<vmem>>, %arg3: memref<2x128xf32, #tpu.memory_space<vmem>>) attributes {dimension_semantics = [], scalar_prefetch = 0 : i64, scratch_operands = 0 : i64, tpu.core_type = #tpu.core_type<tc>} {
    %c0 = arith.constant 0 : index
    %c0_0 = arith.constant 0 : index
    %0 = vector.load %arg0[%c0, %c0_0] : memref<2x128xf32, #tpu.memory_space<vmem>>, vector<2x128xf32>
    %c0_1 = arith.constant 0 : index
    %c0_2 = arith.constant 0 : index
    %1 = vector.load %arg1[%c0_1, %c0_2] : memref<128x384xf32, #tpu.memory_space<vmem>>, vector<128x384xf32>
    %cst = arith.constant dense<0.000000e+00> : vector<2x384xf32>
    %2 = tpu.matmul %0, %1, %cst {dimension_numbers = #tpu.dot_dimension_numbers<[1], [0], [0], [1], [0, 0, 1, 1], [], []>} : vector<2x128xf32>, vector<128x384xf32>, vector<2x384xf32> -> vector<2x384xf32>
    %3 = vector.extract_strided_slice %2 {offsets = [0, 0], sizes = [2, 128], strides = [1, 1]} : vector<2x384xf32> to vector<2x128xf32>
    %4 = arith.mulf %3, %3 : vector<2x128xf32>
    %5 = vector.extract_strided_slice %2 {offsets = [0, 128], sizes = [2, 128], strides = [1, 1]} : vector<2x384xf32> to vector<2x128xf32>
    %6 = arith.addf %4, %5 : vector<2x128xf32>
    %7 = vector.extract_strided_slice %2 {offsets = [0, 256], sizes = [2, 128], strides = [1, 1]} : vector<2x384xf32> to vector<2x128xf32>
    %8 = math.sin %7 : vector<2x128xf32>
    %cst_3 = arith.constant 8.000000e-01 : f32
    %9 = vector.broadcast %cst_3 : f32 to vector<2x128xf32>
    %10 = arith.mulf %8, %9 : vector<2x128xf32>
    %11 = arith.addf %6, %10 : vector<2x128xf32>
    %c0_4 = arith.constant 0 : index
    %c0_5 = arith.constant 0 : index
    %12 = vector.load %arg2[%c0_4, %c0_5] : memref<1x128xf32, #tpu.memory_space<vmem>>, vector<1x128xf32>
    %13 = vector.broadcast %12 : vector<1x128xf32> to vector<2x128xf32>
    %14 = arith.addf %11, %13 : vector<2x128xf32>
    %c0_6 = arith.constant 0 : index
    %c0_7 = arith.constant 0 : index
    %15 = vector.load %arg3[%c0_6, %c0_7] : memref<2x128xf32, #tpu.memory_space<vmem>>, vector<2x128xf32>
    tpu.vector_store %arg3[%c0_6, %c0_7], %14 {strides = array<i32>} : memref<2x128xf32, #tpu.memory_space<vmem>>, vector<2x128xf32>,
    return
  }
}

</mosaic_0001>

<bundles_post_ra>
// kernel: tpu_custom_call.1
= control target key start
LH: loop header
LB: loop body
LE: loop exit
PB: predicated region body
PF: predicated region fallthrough
CT: control target
= control target key end

     0   :  { %8 = vsyncpa [#allocation3], 0  ;;  %s683_s0 = inlined_call_operand.hbm [shape: f32[2,128], index: 0, kind: input, shape index: {}]   ;;  %s684_s1 = inlined_call_operand.hbm [shape: f32[128,384], index: 1, kind: input, shape index: {}]   ;;  %s685_s2 = inlined_call_operand.vmem [shape: f32[1,128], index: 2, kind: input, shape index: {}]   ;;  %s686_s3 = inlined_call_operand.hbm [shape: f32[2,128], index: 3, kind: output, shape index: {}]  }
   0x1   :  { %9 = vsyncpa [#allocation6], 0 }
   0x2   :  { %10 = vsyncpa [#allocation4], 0  ;;  %s571_s12 = smov [#allocation2]   ;;  %s572_s14 = smov [#allocation5]  }
   0x3   :  { %s17_s13 = sshll.u32 %s571_s12, 4  ;;  %s26_s15 = sshll.u32 %s572_s14, 4  ;;  %s18_s13 = int_to_ptr.vmem [resolvable:$true] %s17_s13  ;;  %s605_s15 = int_to_ptr.vmem [resolvable:$true] %s26_s15 }
   0x4   :  { %s499_s18 = scalar_lea.hbm %s683_s0, 32 }
   0x5   :  { %p500_p0 = scmp.ne.s32.totalorder %s683_s0, %s499_s18  ;;  %p503_p1 = scmp.lt.u32.totalorder %s499_s18, %s683_s0 }
   0x7   :  { %p505_p2 = pnand %p503_p1, %p500_p0 }
   0x9   :  { %508 = shalt.err (!%p505_p2)
}
   0xa   :  { %s509_s23 = scalar_lea.vmem %s18_s13, 32  ;;  %p514_p4 = scmp.lt.s32.totalorder %s18_s13, %s18_s13 }
   0xb   :  { %p510_p3 = scmp.ne.s32.totalorder %s18_s13, %s509_s23  ;;  %p515_p5 = scmp.lt.s32.totalorder %s509_s23, %s509_s23 }
   0xd   :  { %p516_p6 = por %p515_p5, %p514_p4 }
   0xf   :  { %p517_p7 = pnand %p516_p6, %p510_p3 }
  0x11   :  { %520 = shalt.err (!%p517_p7)
}
  0x12   :  { %20 = dma.hbm_to_vmem [thread:$0]  %s683_s0, 32, %s18_s13, [#allocation3]  }
  0x13   :  { %s521_s28 = scalar_lea.hbm %s684_s1, 6144 }
  0x14   :  { %p522_p8 = scmp.ne.s32.totalorder %s684_s1, %s521_s28  ;;  %p525_p9 = scmp.lt.u32.totalorder %s521_s28, %s684_s1 }
  0x16   :  { %p527_p10 = pnand %p525_p9, %p522_p8 }
  0x18   :  { %530 = shalt.err (!%p527_p10)
}
  0x19   :  { %s531_s6 = scalar_lea.vmem %s605_s15, 6144  ;;  %p536_p12 = scmp.lt.s32.totalorder %s605_s15, %s605_s15 }
  0x1a   :  { %p532_p11 = scmp.ne.s32.totalorder %s605_s15, %s531_s6  ;;  %p537_p13 = scmp.lt.s32.totalorder %s531_s6, %s531_s6 }
  0x1c   :  { %p538_p0 = por %p537_p13, %p536_p12 }
  0x1e   :  { %p539_p1 = pnand %p538_p0, %p532_p11 }
  0x20   :  { %542 = shalt.err (!%p539_p1)
}
  0x21   :  { %s573_s0 = smov 384   ;;  %s574_s7 = smov 24  }
  0x22   :  { %32 = dma.hbm_to_vmem [thread:$0]  %s684_s1, 6144, %s605_s15, [#allocation6], %s573_s0, %s573_s0, %s574_s7  }
  0x23   :  { %565 = dma.done.wait [#allocation3], 32  }
  0x24   :  { %566 = vsyncadd [#allocation3], 4294967264 }
  0x25   :  { %567 = dma.done.wait [#allocation6], 6144  }
  0x26   :  { %568 = vsyncadd [#allocation6], 4294961152  ;;  %v575_v0 = vmov 0.0|0.0   ;;  %vm576_vm0 = vmmov 0   ;;  %v577_v1 = vmov 0.0   ;;  %v44_v2 = vld [vmem:[#allocation5 + $0x10] sm:$0xff] }
  0x27   :  { %453 = vmatprep.subr.bf16.mxu1 %v575_v0  ;;  %418 = vmatprep.mubr.msk.f32.mxu1 %vm576_vm0, %v577_v1  ;;  %v47_v3 = vld [vmem:[#allocation5 + $0x28] sm:$0xff]  ;;  %v50_v4 = vld [vmem:[#allocation5 + $0x40] sm:$0xff]  ;;  %v53_v6 = vld [vmem:[#allocation5 + $0x58] sm:$0xff]  ;;  %s584_s11 = smov [#allocation7]  }
  0x28   :  { %154 = vmatprep.mubr.f32.mxu0 %v577_v1  ;;  %v454_v5 = vpack.c.bf16 %v47_v3, %v44_v2  ;;  %v457_v7 = vpack.c.bf16 %v53_v6, %v50_v4  ;;  %v56_v8 = vld [vmem:[#allocation5 + $0x70] sm:$0xff]  ;;  %v59_v9 = vld [vmem:[#allocation5 + $0x88] sm:$0xff]  ;;  %v62_v11 = vld [vmem:[#allocation5 + $0xa0] sm:$0xff]  ;;  %s354_s12 = sshll.u32 %s584_s11, 4  ;;  %s355_s12 = int_to_ptr.vmem [resolvable:$true] %s354_s12 }
  0x29   :  { %v43_v10 = vld [vmem:[#allocation5 + $0x8] sm:$0xff]  ;;  %v65_v12 = vld [vmem:[#allocation5 + $0xb8] sm:$0xff]  ;;  %v46_v13 = vld [vmem:[#allocation5 + $0x20] sm:$0xff]  ;;  %v460_v16 = vpack.c.bf16 %v59_v9, %v56_v8  ;;  %s543_s13 = scalar_lea.vmem %s355_s12, 32  ;;  %p548_p3 = scmp.lt.s32.totalorder %s355_s12, %s355_s12 }
  0x2a   :  { %455 = vmatpush3.bf16.msra.mxu1 %v454_v5  ;;  %v42_v14 = vld [vmem:[#allocation5] sm:$0xff]  ;;  %v45_v15 = vld [vmem:[#allocation5 + $0x18] sm:$0xff]  ;;  %v421_v17 = vpack.c.bf16 %v46_v13, %v43_v10  ;;  %v52_v20 = vld [vmem:[#allocation5 + $0x50] sm:$0xff]  ;;  %v463_v27 = vpack.c.bf16 %v65_v12, %v62_v11  ;;  %p544_p2 = scmp.ne.s32.totalorder %s355_s12, %s543_s13  ;;  %p549_p4 = scmp.lt.s32.totalorder %s543_s13, %s543_s13 }
  0x2b   :  { %456 = vmatprep.subr.bf16.mxu1 %v575_v0  ;;  %v423_v18 = vpack.c.bf16 %v45_v15, %v42_v14  ;;  %v49_v19 = vld [vmem:[#allocation5 + $0x38] sm:$0xff]  ;;  %v48_v21 = vld [vmem:[#allocation5 + $0x30] sm:$0xff]  ;;  %v51_v23 = vld [vmem:[#allocation5 + $0x48] sm:$0xff] }
  0x2c   :  { %v425_v22 = vpack.c.bf16 %v52_v20, %v49_v19  ;;  %v55_v24 = vld [vmem:[#allocation5 + $0x68] sm:$0xff]  ;;  %v58_v25 = vld [vmem:[#allocation5 + $0x80] sm:$0xff]  ;;  %422 = vmatprep.subr.bf16.mxu0 %v421_v17  ;;  %v427_v26 = vpack.c.bf16 %v51_v23, %v48_v21  ;;  %v68_v28 = vld [vmem:[#allocation5 + $0xd0] sm:$0xff]  ;;  %p550_p5 = por %p549_p4, %p548_p3 }
  0x2d   :  { %424 = vmatpush1.bf16.msra.mxu0 %v423_v18  ;;  %v429_v29 = vpack.c.bf16 %v58_v25, %v55_v24  ;;  %v54_v30 = vld [vmem:[#allocation5 + $0x60] sm:$0xff]  ;;  %v57_v31 = vld [vmem:[#allocation5 + $0x78] sm:$0xff]  ;;  %v71_v32 = vld [vmem:[#allocation5 + $0xe8] sm:$0xff] }
  0x2e   :  { %458 = vmatpush3.bf16.msra.mxu1 %v457_v7  ;;  %426 = vmatprep.subr.bf16.mxu0 %v425_v22  ;;  %v61_v33 = vld [vmem:[#allocation5 + $0x98] sm:$0xff]  ;;  %v64_v34 = vld [vmem:[#allocation5 + $0xb0] sm:$0xff]  ;;  %v431_v35 = vpack.c.bf16 %v57_v31, %v54_v30  ;;  %v466_v36 = vpack.c.bf16 %v71_v32, %v68_v28  ;;  %v74_v37 = vld [vmem:[#allocation5 + $0x100] sm:$0xff]  ;;  %v580_v32 = vmov 2131351028   ;;  %p551_p6 = pnand %p550_p5, %p544_p2 }
  0x2f   :  { %459 = vmatprep.subr.bf16.mxu1 %v575_v0  ;;  %v433_v38 = vpack.c.bf16 %v64_v34, %v61_v33  ;;  %v60_v39 = vld [vmem:[#allocation5 + $0x90] sm:$0xff]  ;;  %v63_v40 = vld [vmem:[#allocation5 + $0xa8] sm:$0xff]  ;;  %v77_v41 = vld [vmem:[#allocation5 + $0x118] sm:$0xff] }
  0x30   :  { %v67_v42 = vld [vmem:[#allocation5 + $0xc8] sm:$0xff]  ;;  %v70_v43 = vld [vmem:[#allocation5 + $0xe0] sm:$0xff]  ;;  %v435_v44 = vpack.c.bf16 %v63_v40, %v60_v39  ;;  %v469_v45 = vpack.c.bf16 %v77_v41, %v74_v37  ;;  %v80_v46 = vld [vmem:[#allocation5 + $0x130] sm:$0xff]  ;;  %v583_v41 = vmov 1326507024  }
  0x31   :  { %428 = vmatpush1.bf16.msra.mxu0 %v427_v26  ;;  %v437_v47 = vpack.c.bf16 %v70_v43, %v67_v42  ;;  %v66_v48 = vld [vmem:[#allocation5 + $0xc0] sm:$0xff]  ;;  %v69_v49 = vld [vmem:[#allocation5 + $0xd8] sm:$0xff]  ;;  %v83_v50 = vld [vmem:[#allocation5 + $0x148] sm:$0xff] }
  0x32   :  { %461 = vmatpush3.bf16.msra.mxu1 %v460_v16  ;;  %430 = vmatprep.subr.bf16.mxu0 %v429_v29  ;;  %v73_v51 = vld [vmem:[#allocation5 + $0xf8] sm:$0xff]  ;;  %v76_v52 = vld [vmem:[#allocation5 + $0x110] sm:$0xff]  ;;  %v439_v53 = vpack.c.bf16 %v69_v49, %v66_v48  ;;  %v472_v54 = vpack.c.bf16 %v83_v50, %v80_v46  ;;  %v86_v55 = vld [vmem:[#allocation5 + $0x160] sm:$0xff]  ;;  %v579_v29 = vmov 2475754826  }
  0x33   :  { %462 = vmatprep.subr.bf16.mxu1 %v575_v0  ;;  %v441_v56 = vpack.c.bf16 %v76_v52, %v73_v51  ;;  %v72_v57 = vld [vmem:[#allocation5 + $0xf0] sm:$0xff]  ;;  %v75_v58 = vld [vmem:[#allocation5 + $0x108] sm:$0xff]  ;;  %v89_v59 = vld [vmem:[#allocation5 + $0x178] sm:$0xff] }
  0x34   :  { %v79_v60 = vld [vmem:[#allocation5 + $0x128] sm:$0xff]  ;;  %v82_v61 = vld [vmem:[#allocation5 + $0x140] sm:$0xff]  ;;  %v443_v62 = vpack.c.bf16 %v75_v58, %v72_v57  ;;  %v475_v63 = vpack.c.bf16 %v89_v59, %v86_v55  ;;  %v81_v3 = vld [vmem:[#allocation5 + $0x138] sm:$0xff] }
  0x35   :  { %432 = vmatpush1.bf16.msra.mxu0 %v431_v35  ;;  %v445_v1 = vpack.c.bf16 %v82_v61, %v79_v60  ;;  %v78_v2 = vld [vmem:[#allocation5 + $0x120] sm:$0xff]  ;;  %v85_v4 = vld [vmem:[#allocation5 + $0x158] sm:$0xff]  ;;  %v88_v5 = vld [vmem:[#allocation5 + $0x170] sm:$0xff]  ;;  %v581_v35 = vmov 2102212464  }
  0x36   :  { %464 = vmatpush3.bf16.msra.mxu1 %v463_v27  ;;  %434 = vmatprep.subr.bf16.mxu0 %v433_v38  ;;  %v447_v6 = vpack.c.bf16 %v81_v3, %v78_v2  ;;  %v41_v7 = vld [vmem:[#allocation2] sm:$0x3]  ;;  %v449_v8 = vpack.c.bf16 %v88_v5, %v85_v4  ;;  %v84_v9 = vld [vmem:[#allocation5 + $0x150] sm:$0xff]  ;;  %v87_v10 = vld [vmem:[#allocation5 + $0x168] sm:$0xff]  ;;  %v578_v27 = vmov 683565275  }
  0x37   :  { %465 = vmatprep.subr.bf16.mxu1 %v575_v0  ;;  %v451_v11 = vpack.c.bf16 %v87_v10, %v84_v9  ;;  %v582_v38 = vmov 920167782  }
  0x39   :  { %436 = vmatpush1.bf16.msra.mxu0 %v435_v44 }
  0x3a   :  { %467 = vmatpush3.bf16.msra.mxu1 %v466_v36  ;;  %438 = vmatprep.subr.bf16.mxu0 %v437_v47 }
  0x3b   :  { %468 = vmatprep.subr.bf16.mxu1 %v575_v0 }
  0x3d   :  { %440 = vmatpush1.bf16.msra.mxu0 %v439_v53 }
  0x3e   :  { %470 = vmatpush3.bf16.msra.mxu1 %v469_v45  ;;  %442 = vmatprep.subr.bf16.mxu0 %v441_v56 }
  0x3f   :  { %471 = vmatprep.subr.bf16.mxu1 %v575_v0 }
  0x41   :  { %444 = vmatpush1.bf16.msra.mxu0 %v443_v62 }
  0x42   :  { %473 = vmatpush3.bf16.msra.mxu1 %v472_v54  ;;  %446 = vmatprep.subr.bf16.mxu0 %v445_v1 }
  0x43   :  { %474 = vmatprep.subr.bf16.mxu1 %v575_v0 }
  0x45   :  { %448 = vmatpush1.bf16.msra.mxu0 %v447_v6 }
  0x46   :  { %476 = vmatpush3.bf16.msra.mxu1 %v475_v63  ;;  %450 = vmatprep.subr.bf16.mxu0 %v449_v8 }
  0x49   :  { %419 = vmatmul.mubr.f32.vlgmr.msra.gmra.mrb[0].mxu1 %v41_v7  ;;  %452 = vmatpush1.bf16.msra.mxu0 %v451_v11 }
  0x4c   :  { %155 = vmatmul.mubr.f32.vlgmr.msra.gmra.mrb[0].mxu0 %v41_v7 }
 0x11c   :  { %v644_v12 = vpop.f32.mrb[0].mxu1 }
 0x11d   :  { %v236_v0 = vand.u32 2139095040, %v644_v12  ;;  %v420_v13 = vpop.f32.mrb[1].mxu1  ;;  %v233_v20 = vand.u32 2147483647, %v644_v12  ;;  %vm235_vm8 = vcmp.lt.s32.totalorder %v644_v12, 0  ;;  %vm325_vm13 = vweird.f32 %v644_v12 }
 0x11f   :  { %v237_v14 = vshrl.u32 %v236_v0, 23  ;;  %v156_v17 = vpop.f32.mrb[0].mxu0  ;;  %v240_v24 = vand.u32 8388607, %v233_v20  ;;  %vm234_vm9 = vcmp.le.f32.partialorder %v233_v20, 0.7853982 }
 0x120   :  { %v231_v18 = vmul.f32 %v156_v17, %v156_v17  ;;  %v158_v19 = vpop.f32.mrb[1].mxu0 }
 0x121   :  { %v364_v15 = vadd.s32 4294967169, %v237_v14  ;;  %v241_v43 = vor.u32 8388608, %v240_v24 }
 0x122   :  { %v648_v22 = vadd.f32 %v231_v18, %v158_v19 }
 0x123   :  { %v243_v16 = vadd.s32 1, %v364_v15  ;;  %v281_v57 = vshll.u32 %v241_v43, 8 }
 0x125   :  { %vm244_vm1 = vcmp.gt.s32.totalorder %v243_v16, 0 }
 0x126   :  { %v245_v21 = vsel %vm244_vm1, %v243_v16, 0 }
 0x127   :  { %v247_v23 = vand.u32 31, %v245_v21  ;;  %v246_v26 = vshrl.u32 %v245_v21, 5 }
 0x129   :  { %v248_v25 = vsub.s32 32, %v247_v23  ;;  %v250_v28 = vshll.u32 %v578_v27, %v247_v23  ;;  %v253_v30 = vshll.u32 %v579_v29, %v247_v23  ;;  %v256_v34 = vshll.u32 %v580_v32, %v247_v23 }
 0x12a   :  { %v259_v37 = vshll.u32 %v581_v35, %v247_v23  ;;  %v262_v40 = vshll.u32 %v582_v38, %v247_v23  ;;  %vm265_vm2 = vcmp.lt.s32.totalorder %v246_v26, 1  ;;  %vm268_vm3 = vcmp.lt.s32.totalorder %v246_v26, 4 }
 0x12b   :  { %v251_v31 = vshrl.u32 %v579_v29, %v248_v25  ;;  %v254_v33 = vshrl.u32 %v580_v32, %v248_v25  ;;  %v257_v36 = vshrl.u32 %v581_v35, %v248_v25  ;;  %v260_v39 = vshrl.u32 %v582_v38, %v248_v25 }
 0x12c   :  { %v263_v42 = vshrl.u32 %v583_v41, %v248_v25  ;;  %v249_v52 = vshrl.u32 %v578_v27, %v248_v25  ;;  %vm267_vm4 = vcmp.lt.s32.totalorder %v246_v26, 3  ;;  %vm266_vm5 = vcmp.lt.s32.totalorder %v246_v26, 2 }
 0x12d   :  { %v252_v44 = vor.u32 %v251_v31, %v250_v28  ;;  %v255_v45 = vor.u32 %v254_v33, %v253_v30  ;;  %v258_v46 = vor.u32 %v257_v36, %v256_v34  ;;  %v261_v47 = vor.u32 %v260_v39, %v259_v37 }
 0x12e   :  { %v264_v48 = vor.u32 %v263_v42, %v262_v40 }
 0x12f   :  { %v270_v49 = vsel %vm268_vm3, %v258_v46, 2102212464  ;;  %v273_v50 = vsel %vm265_vm2, %v252_v44, %v255_v45  ;;  %v277_v51 = vsel %vm265_vm2, %v255_v45, %v258_v46  ;;  %v274_v53 = vsel %vm268_vm3, %v261_v47, 920167782 }
 0x130   :  { %v278_v54 = vsel %vm268_vm3, %v264_v48, 1326507024  ;;  %v275_v55 = vsel %vm267_vm4, %v258_v46, %v274_v53  ;;  %v269_v58 = vsel %vm265_vm2, %v249_v52, %v252_v44  ;;  %v271_v59 = vsel %vm267_vm4, %v255_v45, %v270_v49 }
 0x131   :  { %v279_v56 = vsel %vm267_vm4, %v261_v47, %v278_v54  ;;  %v276_v60 = vsel %vm266_vm5, %v273_v50, %v275_v55  ;;  %v272_v3 = vsel %vm266_vm5, %v269_v58, %v271_v59  ;;  %v368_v47 = vld [vmem:[%s685_s2] ss:$0 sm:$0xff] }
 0x132   :  { %v280_v61 = vsel %vm266_vm5, %v277_v51, %v279_v56  ;;  %v655_v1 = vmul.u32.u64.low %v281_v57, %v276_v60  ;;  %v656_v2 = vmul.u32.u64.high %v281_v57, %v276_v60, %v655_v1  ;;  %v288_v5 = vmul.u32 %v281_v57, %v272_v3 }
 0x133   :  { %v652_v62 = vmul.u32.u64.low %v281_v57, %v280_v61  ;;  %v653_v63 = vmul.u32.u64.high %v281_v57, %v280_v61, %v652_v62 }
 0x134   :  { %v291_v4 = vadd.s32 1, %v656_v2 }
 0x135   :  { %vm290_vm6 = vc.u32 %v653_v63, %v655_v1  ;;  %v289_v17 = vadd.s32 %v655_v1, %v653_v63 }
 0x136   :  { %v292_v6 = vsel %vm290_vm6, %v291_v4, %v656_v2 }
 0x137   :  { %v293_v7 = vadd.s32 %v292_v6, %v288_v5 }
 0x139   :  { %v294_v8 = vadd.s32 536870912, %v293_v7 }
 0x13b   :  { %v295_v9 = vshrl.u32 %v294_v8, 30 }
 0x13d   :  { %v296_v10 = vshll.u32 %v295_v9, 30  ;;  %v319_v31 = vsub.s32 4, %v295_v9 }
 0x13f   :  { %v297_v11 = vsub.s32 %v293_v7, %v296_v10  ;;  %v320_v34 = vsel %vm235_vm8, %v319_v31, %v295_v9 }
 0x140   :  { %v322_v36 = vsel %vm234_vm9, 0, %v320_v34 }
 0x141   :  { %v299_v0 = vsub.s32 0, %v297_v11  ;;  %v326_v37 = vadd.s32 3, %v322_v36 }
 0x143   :  { %v365_v13 = vmin.u32 %v299_v0, %v297_v11  ;;  %v327_v38 = vand.u32 3, %v326_v37 }
 0x145   :  { %v301_v14 = vclz %v365_v13  ;;  %vm332_vm10 = vcmp.eq.s32.totalorder %v327_v38, 2  ;;  %vm329_vm11 = vcmp.eq.s32.totalorder %v327_v38, 0  ;;  %vm328_vm12 = vcmp.lt.s32.totalorder %v327_v38, 2 }
 0x147   :  { %v366_v15 = vadd.s32 4294967294, %v301_v14 }
 0x149   :  { %vm367_vm7 = vcmp.lt.s32.totalorder %v366_v15, 0 }
 0x14a   :  { %v304_v16 = vsel %vm367_vm7, 0, %v366_v15 }
 0x14b   :  { %v305_v18 = vsub.s32 32, %v304_v16  ;;  %v309_v19 = vsub.s32 4294967266, %v304_v16  ;;  %v306_v21 = vshll.u32 %v297_v11, %v304_v16 }
 0x14d   :  { %v307_v23 = vshrl.u32 %v289_v17, %v305_v18  ;;  %v310_v24 = vadd.s32 127, %v309_v19 }
 0x14f   :  { %v308_v25 = vor.u32 %v307_v23, %v306_v21  ;;  %v311_v26 = vshll.u32 %v310_v24, 23 }
 0x151   :  { %v312_v27 = vor.u32 4788187, %v311_v26  ;;  %v315_v29 = vcvt.s32.f32 %v308_v25 }
 0x153   :  { %v313_v28 = vand.u32 2147483647, %v312_v27 }
 0x155   :  { %v316_v30 = vmul.f32 %v315_v29, %v313_v28 }
 0x157   :  { %v317_v32 = vxor.u32 2147483648, %v316_v30 }
 0x159   :  { %v318_v33 = vsel %vm235_vm8, %v317_v32, %v316_v30 }
 0x15a   :  { %v321_v35 = vsel %vm234_vm9, %v644_v12, %v318_v33 }
 0x15b   :  { %495 = vcosq.f32 %v321_v35 }
 0x15c   :  { %497 = vsinq.f32 %v321_v35 }
 0x165   :  { %v496_v39 = vpop.eup %495 }
 0x166   :  { %v498_v40 = vpop.eup %497  ;;  %v333_v41 = vxor.u32 2147483648, %v496_v39 }
 0x167   :  { %v330_v42 = vxor.u32 2147483648, %v498_v40 }
 0x168   :  { %v334_v43 = vsel %vm332_vm10, %v333_v41, %v498_v40 }
 0x169   :  { %v331_v44 = vsel %vm329_vm11, %v496_v39, %v330_v42 }
 0x16a   :  { %v335_v20 = vsel %vm328_vm12, %v331_v44, %v334_v43 }
 0x16b   :  { %v336_v45 = vsel %vm325_vm13, nan, %v335_v20 }
 0x16c   :  { %v337_v46 = vmul.f32 0.8, %v336_v45 }
 0x16e   :  { %v338_v48 = vadd.f32 %v337_v46, %v648_v22 }
 0x170   :  { %v346_v49 = vadd.f32 %v368_v47, %v338_v48 }
 0x172   :  { %347 = vst [vmem:[#allocation7] sm:$0x3] %v346_v49 }
 0x173   :  { %554 = shalt.err (!%p551_p6)
}
 0x174   :  { %s555_s16 = scalar_lea.hbm %s686_s3, 32 }
 0x175   :  { %p556_p7 = scmp.ne.s32.totalorder %s686_s3, %s555_s16  ;;  %p559_p8 = scmp.lt.u32.totalorder %s555_s16, %s686_s3 }
 0x177   :  { %p561_p9 = pnand %p559_p8, %p556_p7 }
 0x179   :  { %564 = shalt.err (!%p561_p9)
}
 0x17a   :  { %357 = dma.vmem_to_hbm [thread:$0]  %s355_s12, 32, %s686_s3, [#allocation4]  }
 0x17b   :  { %569 = dma.done.wait [#allocation4], 32  }
 0x17c   :  { %570 = vsyncadd [#allocation4], 4294967264 }
 0x17d   :  { %361 = vsyncpa [#allocation3], 1 }
 0x17e   :  { %362 = vsyncpa [#allocation6], 1 }
 0x17f   :  { %363 = vsyncpa [#allocation4], 1 }

</bundles_post_ra>
